<compile_context>
chip_gen: v5e
topology: v5e:2x2
jax: 0.10.0
libtpu: 0.0.40
codegen_flags: <defaults>
</compile_context>

<pallas_src>
import jax
import jax.numpy as jnp
from jax.experimental import pallas as pl
from jax.experimental.pallas import tpu as pltpu

TIMESTEP_F = 500.0
CLAMP_MIN = 0.0
CLAMP_MAX = 1.0

_SUBLANE = 8
_LANE = 128
# ~2 MiB f32 block: 4096 rows * 128 lanes * 4 B. Double-buffered in+out
# => ~8 MiB of VMEM, safe on v5e (16 MiB default) / v6e / v7x.
_TARGET_BLOCK_ROWS = 4096
_VMEM_LIMIT_BYTES = 32 * 1024 * 1024


def _clamp_q_kernel(x_ref, o_ref):
    # Upcast so the quantization grid survives bf16/fp8 inputs.
    x = x_ref[...].astype(jnp.float32)
    x = jnp.clip(x, CLAMP_MIN, CLAMP_MAX)            # torch.clamp(x, 0, 1)
    x = jnp.floor(x * TIMESTEP_F) / TIMESTEP_F       # STEFunction.forward
    o_ref[...] = x.astype(o_ref.dtype)


def _choose_block_rows(rows):
    """Pick a block row count: big (~2 MiB f32) but with >=2 grid steps."""
    if rows <= _SUBLANE:
        # Tiny input: single full-extent block (allowed: block == array dims).
        return rows
    half = -(-rows // 2)                              # ceil(rows / 2)
    half = -(-half // _SUBLANE) * _SUBLANE            # round up to multiple of 8
    return max(_SUBLANE, min(_TARGET_BLOCK_ROWS, half))


def clamp_q(x):
    """Elementwise clamp-to-[0,1] + quantize, matching Clamp_q_.forward."""
    orig_shape = x.shape
    orig_dtype = x.dtype

    flat = x.reshape(-1)
    n = flat.shape[0]

    # Only pad (one extra HBM pass) when numel is not a multiple of 128.
    lane_pad = (-n) % _LANE
    if lane_pad:
        flat = jnp.pad(flat, (0, lane_pad))
    rows = (n + lane_pad) // _LANE
    slab = flat.reshape(rows, _LANE)

    block_rows = _choose_block_rows(rows)
    grid = (pl.cdiv(rows, block_rows),)               # boundary blocks are masked

    out = pl.pallas_call(
        _clamp_q_kernel,
        out_shape=jax.ShapeDtypeStruct((rows, _LANE), orig_dtype),
        grid_spec=pltpu.PrefetchScalarGridSpec(
            num_scalar_prefetch=0,
            grid=grid,
            in_specs=[pl.BlockSpec((block_rows, _LANE), lambda i: (i, 0))],
            out_specs=pl.BlockSpec((block_rows, _LANE), lambda i: (i, 0)),
        ),
        compiler_params=pltpu.CompilerParams(
            dimension_semantics=("parallel",),
            vmem_limit_bytes=_VMEM_LIMIT_BYTES,
        ),
    )(slab)

    out_flat = out.reshape(-1)
    if lane_pad:
        out_flat = out_flat[:n]
    return out_flat.reshape(orig_shape)


def _reference(x):
    x = jnp.clip(x.astype(jnp.float32), CLAMP_MIN, CLAMP_MAX)
    return (jnp.floor(x * TIMESTEP_F) / TIMESTEP_F).astype(x.dtype)


if __name__ == "__main__":
    key = jax.random.PRNGKey(0)

    test_shapes = [
        (2, 4, 16, 16),   # aligned: numel = 2048 -> 16 rows, 2 parallel blocks
        (2, 3, 16, 16),   # numel = 1536 -> 12 rows, masked boundary block
        (3, 5, 7, 9),     # ragged numel = 945 -> lane padding path
    ]

    for i, shape in enumerate(test_shapes):
        k = jax.random.fold_in(key, i)
        x = jax.random.normal(k, shape, dtype=jnp.float32)

        y = clamp_q(x)
        y = jax.block_until_ready(y)

        y_ref = _reference(x)
        assert y.shape == x.shape, f"shape mismatch for {shape}"
        assert y.dtype == x.dtype, f"dtype mismatch for {shape}"
        assert jnp.allclose(y, y_ref, atol=1e-6), f"mismatch vs reference for {shape}"

    print("KERNEL_OK")
</pallas_src>

<mosaic_0001>
module attributes {stable_mosaic.version = 11 : i64} {
  func.func @_clamp_q_kernel(%arg0: i32, %arg1: memref<8x128xf32, #tpu.memory_space<vmem>>, %arg2: memref<8x128xf32, #tpu.memory_space<vmem>>) attributes {dimension_semantics = [#tpu.dimension_semantics<parallel>], iteration_bounds = array<i64: 2>, scalar_prefetch = 0 : i64, scratch_operands = 0 : i64, tpu.core_type = #tpu.core_type<tc>, window_params = [{transform_indices = @transform_0, window_bounds = array<i64: 8, 128>}, {transform_indices = @transform_1, window_bounds = array<i64: 8, 128>}]} {
    %c0 = arith.constant 0 : index
    %c0_0 = arith.constant 0 : index
    %0 = vector.load %arg1[%c0, %c0_0] : memref<8x128xf32, #tpu.memory_space<vmem>>, vector<8x128xf32>
    %cst = arith.constant 0.000000e+00 : f32
    %cst_1 = arith.constant 1.000000e+00 : f32
    %1 = vector.broadcast %cst : f32 to vector<8x128xf32>
    %2 = arith.maximumf %1, %0 : vector<8x128xf32>
    %3 = vector.broadcast %cst_1 : f32 to vector<8x128xf32>
    %4 = arith.minimumf %3, %2 : vector<8x128xf32>
    %cst_2 = arith.constant 5.000000e+02 : f32
    %5 = vector.broadcast %cst_2 : f32 to vector<8x128xf32>
    %6 = arith.mulf %4, %5 : vector<8x128xf32>
    %7 = math.floor %6 : vector<8x128xf32>
    %cst_3 = arith.constant 5.000000e+02 : f32
    %8 = vector.broadcast %cst_3 : f32 to vector<8x128xf32>
    %9 = arith.divf %7, %8 : vector<8x128xf32>
    %c0_4 = arith.constant 0 : index
    %c0_5 = arith.constant 0 : index
    %10 = vector.load %arg2[%c0_4, %c0_5] : memref<8x128xf32, #tpu.memory_space<vmem>>, vector<8x128xf32>
    tpu.vector_store %arg2[%c0_4, %c0_5], %9 {strides = array<i32>} : memref<8x128xf32, #tpu.memory_space<vmem>>, vector<8x128xf32>,
    return
  }
  func.func @transform_0(%arg0: i32) -> (i32, i32) {
    %c0_i32 = arith.constant 0 : i32
    %c0_i32_0 = arith.constant 0 : i32
    return %arg0, %c0_i32 : i32, i32
  }
  func.func @transform_1(%arg0: i32) -> (i32, i32) {
    %c0_i32 = arith.constant 0 : i32
    %c0_i32_0 = arith.constant 0 : i32
    return %arg0, %c0_i32 : i32, i32
  }
}

</mosaic_0001>

<bundles_post_ra>
// kernel: tpu_custom_call.1
= control target key start
LH: loop header
LB: loop body
LE: loop exit
PB: predicated region body
PF: predicated region fallthrough
CT: control target
= control target key end

     0   :  { %6 = vsyncpa [#allocation3], 0  ;;  %s531_s0 = inlined_call_operand.hbm [shape: f32[16,128], index: 0, kind: input, shape index: {}]   ;;  %s532_s1 = inlined_call_operand.hbm [shape: f32[16,128], index: 1, kind: output, shape index: {}]  }
   0x1   :  { %8 = vsyncpa [#allocation3 + $0x1], 0 }
   0x2   :  { %9 = vsyncpa [#allocation4], 0 }
   0x3   :  { %11 = vsyncpa [#allocation4 + $0x1], 0  ;;  %s404_s6 = smov 0   ;;  %s406_s7 = smov 0  }
   0x4   :  { %s408_s8 = smov 0   ;;  %s410_s9 = smov 0  }
   0x5 LB: > { %s425_s10 = sadd.s32 4294967295, %s391_s9   ;;  %s234_s11 = sadd.s32 4294967294, %s391_s9   ;;  %s391_s9 = sphi %s410_s9, %s542_s9   ;;  %s387_s8 = sphi %s408_s8, %s541_s8   ;;  %s383_s7 = sphi %s406_s7, %s540_s7   ;;  %s379_s6 = sphi %s404_s6, %s539_s6  }
   0x6   : > { %s429_s12 = sadd.s32 1, %s391_s9   ;;  %s24_s13 = sadd.s32 1, %s387_s8 }
   0x7   : > { %s21_s14 = ssub.s32 %s391_s9, %s429_s12  ;;  %p31_p0 = scmp.ne.s32.totalorder %s387_s8, %s383_s7 }
   0x8   : > { %p22_p1 = scmp.eq.s32.totalorder %s21_s14, 0  ;;  %p32_p2 = scmp.eq.s32.totalorder %s391_s9, 0 }
   0x9   : > { %p37_p3 = scmp.ne.s32.totalorder %s383_s7, %s379_s6  ;;  %p38_p4 = scmp.eq.s32.totalorder %s425_s10, 0 }
   0xa   : > { %s441_s15 = scalar_select %p22_p1, %s387_s8, %s24_s13  }
   0xb   : > { %p443_p5 = por %p32_p2, %p31_p0  ;;  %p447_p6 = por %p38_p4, %p37_p3 }
   0xc   : > { %p61_p7 = scmp.eq.s32.totalorder %s425_s10, 1  ;;  %p67_p8 = scmp.eq.s32.totalorder %s234_s11, 1 }
   0xd   : > { %p258_p10 = scmp.lt.s32.totalorder %s391_s9, 2  ;;  %s87_s20 = sand.u32 1, %s387_s8  }
   0xe   : > { %p454_p11 = por %p61_p7, %p31_p0  ;;  %p458_p12 = por %p67_p8, %p37_p3 }
   0xf   : > { %s238_s21 = sshll.u32 %s391_s9, 3  ;;  %s237_s22 = sshll.u32 %s87_s20, 3 }
  0x10   : > { %s95_s25 = scalar_lea.hbm %s531_s0, %s238_s21  ;;  %s91_s27 = scalar_lea.vmem [#allocation2], %s237_s22 }
  0x11   : > { %s97_s26 = sshll.u32 %s95_s25, 4  ;;  %s99_s28 = sshll.u32 %s91_s27, 4  ;;  %s98_s26 = int_to_ptr.hbm [resolvable:$true] %s97_s26  ;;  %s100_s28 = int_to_ptr.vmem [resolvable:$true] %s99_s28 }
  0x12   : > { %p469_p13 = pnand %p258_p10, %p443_p5  ;;  %p239_p0 = scmp.ge.s32.totalorder %s391_s9, 1 }
  0x13   : > { %p104_p1 = scmp.lt.s32.totalorder %s391_s9, 3  ;;  %s88_s30 = scalar_lea.sflag [#allocation3], %s87_s20 }
  0x14   : > { %s295_s2 = sshra.s32 %s98_s26, 4  ;;  %p299_p3 = pneg %p469_p13  ;;  %s296_s2 = int_to_ptr.hbm [resolvable:$true] %s295_s2 }
  0x15   : > { %s297_s3 = scalar_lea.hbm %s296_s2, 8  ;;  %s302_s11 = scalar_lea.hbm %s531_s0, 16 }
  0x16   : > { %p298_p2 = scmp.ne.s32.totalorder %s296_s2, %s297_s3  ;;  %p303_p5 = scmp.lt.s32.totalorder %s296_s2, %s531_s0 }
  0x17   : > { %p304_p8 = scmp.lt.s32.totalorder %s302_s11, %s297_s3 }
  0x18   : > { %p300_p4 = pnand %p299_p3, %p298_p2 }
  0x19   : > { %p305_p10 = por %p304_p8, %p303_p5 }
  0x1a   : > { %p301_p7 = pneg %p300_p4 }
  0x1c   : > { %p306_p9 = pnand %p305_p10, %p301_p7 }
  0x1e   : > { %309 = shalt.err (!%p306_p9)
}
  0x1f   : > { %253 = dma.hbm_to_vmem [thread:$0]  (!%p469_p13), %s98_s26, 128, %s100_s28, %s88_s30  }
  0x20   : > { %p105_p2 = pnand %p239_p0, %p104_p1 }
  0x21   : > { %s490_s16 = sand.u32 (!%p105_p2), 1, %s383_s7  }
  0x22   : > { %108 = sbr.rel (%p105_p2) target bundleno = 62 (0x3e), region = 24  ;;  %s240_s20 = sshll.u32 (!%p105_p2), %s490_s16, 3 }
  0x23   : > { %s111_s21 = scalar_lea.sflag (!%p105_p2), [#allocation3], %s490_s16  ;;  %s114_s22 = scalar_lea.vmem (!%p105_p2), [#allocation2], %s240_s20 }
  0x27   : > { %370 = dma.done.wait (%p447_p6), %s111_s21, 128  }
  0x28   : > { %372 = vsyncadd (%p447_p6), %s111_s21, 4294967168  ;;  %v393_v0 = vmov 500.0   ;;  %v134_v2 = vld [vmem:[%s114_s22] sm:$0xff]  ;;  %s243_s23 = sshll.u32 %s425_s10, 3  ;;  %s133_s17 = scalar_lea.vmem [#allocation5], %s240_s20 }
  0x29   : > { %293 = vrcp.f32 %v393_v0  ;;  %v135_v3 = vmax.f32 %v134_v2, 0.0  ;;  %s159_s26 = scalar_lea.hbm %s532_s1, %s243_s23  ;;  %s161_s27 = sshll.u32 %s133_s17, 4  ;;  %s162_s27 = int_to_ptr.vmem [resolvable:$true] %s161_s27 }
  0x2a   : > { %s163_s28 = sshll.u32 %s159_s26, 4  ;;  %s149_s10 = scalar_lea.sflag [#allocation4], %s490_s16  ;;  %s164_s28 = int_to_ptr.hbm [resolvable:$true] %s163_s28 }
  0x2b   : > { %v136_v5 = vmin.f32 %v135_v3, 1.0  ;;  %s339_s29 = sshra.s32 %s164_s28, 4  ;;  %s345_s4 = scalar_lea.hbm %s532_s1, 16  ;;  %s340_s29 = int_to_ptr.hbm [resolvable:$true] %s339_s29 }
  0x2c   : > { %s341_s30 = scalar_lea.hbm %s340_s29, 8  ;;  %p346_p0 = scmp.lt.s32.totalorder %s340_s29, %s532_s1 }
  0x2d   : > { %v137_v7 = vmul.f32 500.0, %v136_v5  ;;  %p342_p6 = scmp.ne.s32.totalorder %s340_s29, %s341_s30  ;;  %p347_p1 = scmp.lt.s32.totalorder %s345_s4, %s341_s30 }
  0x2f   : > { %v294_v1 = vpop.eup %293  ;;  %v138_v9 = vfloor.f32 %v137_v7  ;;  %p343_p9 = pnand %p342_p6, %p454_p11  ;;  %p348_p3 = por %p347_p1, %p346_p0 }
  0x30   : > { %v140_v4 = vmul.f32 500.0, %v294_v1  ;;  %vm144_vm0 = vweird.f32 %v294_v1 }
  0x31   : > { %p344_p13 = pneg %p343_p9 }
  0x32   : > { %v141_v6 = vsub.f32 1.0, %v140_v4 }
  0x33   : > { %p349_p4 = pnand %p348_p3, %p344_p13 }
  0x34   : > { %v142_v8 = vmul.f32 %v294_v1, %v141_v6 }
  0x36   : > { %v143_v10 = vadd.f32 %v294_v1, %v142_v8 }
  0x38   : > { %v145_v11 = vsel %vm144_vm0, %v294_v1, %v143_v10 }
  0x39   : > { %v146_v12 = vmul.f32 %v145_v11, %v138_v9 }
  0x3b   : > { %147 = vst [vmem:[%s133_s17] sm:$0xff] %v146_v12 }
  0x3c   : > { %352 = shalt.err (!%p349_p4)
}
  0x3d   : > { %248 = dma.vmem_to_hbm [thread:$0]  (%p454_p11), %s162_s27, 128, %s164_s28, %s149_s10  }
  0x3e PF: > { %s175_s13 = sand.u32 1, %s379_s6   ;;  %p538_p7 = scmp.ge.s32.totalorder %s391_s9, 2 }
  0x3f   : > { %s176_s14 = scalar_lea.sflag [#allocation4], %s175_s13 }
  0x40   : > { %p255_p5 = pnand %p538_p7, %p458_p12 }
  0x42   : > { %p256_p8 = pneg %p255_p5 }
  0x44   : > { %374 = dma.done.wait (%p256_p8), %s176_s14, 128  }
  0x45   : > { %376 = vsyncadd (%p256_p8), %s176_s14, 4294967168  ;;  %p14_p10 = scmp.ge.s32.totalorder %s429_s12, 4   ;;  %s539_s6 = smov %s383_s7 }
  0x46   : > { %s540_s7 = smov %s387_s8  ;;  %s541_s8 = smov %s441_s15 }
  0x47   : > { %s542_s9 = smov %s429_s12  ;;  %16 = sbr.rel (!%p14_p10) target bundleno = 5 (0x5), region = 69 }
  0x4c   :  { %182 = vsyncpa [#allocation3], 1 }
  0x4d   :  { %184 = vsyncpa [#allocation3 + $0x1], 1 }
  0x4e   :  { %185 = vsyncpa [#allocation4], 1 }
  0x4f   :  { %187 = vsyncpa [#allocation4 + $0x1], 1 }

</bundles_post_ra>
